<compile_context>
chip_gen: v7x
topology: tpu7x:2x2x1
jax: 0.10.0
libtpu: 0.0.40
codegen_flags: <defaults>
</compile_context>

<pallas_src>
import functools

import jax
import jax.numpy as jnp
from jax.experimental import pallas as pl
from jax.experimental.pallas import tpu as pltpu


def matching_head_kernel(x_ref, w1_ref, b1_ref, w2_ref, b2_ref, o_ref):
    # Pooler dense on the MXU with f32 accumulation.
    h = jnp.dot(x_ref[...], w1_ref[...], preferred_element_type=jnp.float32)
    h = h + b1_ref[...].astype(jnp.float32)
    h = jnp.tanh(h)  # f32 activation math (EUP/VPU)

    # fc with out_features == 1: VPU multiply + lane reduction instead of a
    # (block_b, H) @ (H, 1) matmul that would occupy a single MXU column.
    y = jnp.sum(h * w2_ref[...].astype(jnp.float32), axis=-1)  # (block_b,)
    y = y + b2_ref[0, 0]

    # Lane-dense store: (1, block_b) slab with batch on the lane axis.
    o_ref[...] = y[None, :].astype(o_ref.dtype)


def _default_block_b(B):
    # Largest lane-aligned tile that still leaves >= 2 grid steps (so the
    # "parallel" batch axis can be split across v7x's 2 TensorCores); small
    # batches use a single full-array block (no (8,128) alignment needed).
    if B <= 128:
        return B
    for cand in (1024, 512, 256, 128):
        if B >= 2 * cand:
            return cand
    return 128


@functools.partial(jax.jit, static_argnames=("block_b", "compute_dtype"))
def matching_head(x, w1, b1, w2, b2, *, block_b=None, compute_dtype=None):
    B, H = x.shape
    orig_dtype = x.dtype
    if block_b is None:
        block_b = _default_block_b(B)

    num_blocks = -(-B // block_b)  # cdiv
    padded_B = num_blocks * block_b
    if padded_B != B:
        x = jnp.pad(x, ((0, padded_B - B), (0, 0)))

    # Cast only the first-matmul operands (x, w1); keep biases / activations in f32.
    if compute_dtype is not None:
        x = x.astype(compute_dtype)
        w1 = w1.astype(compute_dtype)

    b1 = jnp.reshape(b1, (1, H)).astype(jnp.float32)
    w2_row = jnp.reshape(w2, (1, H)).astype(jnp.float32)  # fc weight as a lane row
    b2 = jnp.reshape(b2, (1, 1)).astype(jnp.float32)

    # VMEM budget: x tile double-buffered, w1 single-buffered, small padded tiles
    # for b1/w2/out, plus intermediate headroom. Clamped to [32 MiB, 64 MiB] so it
    # is portable to v7x's 64 MiB physical VMEM while raising v5e's 16 MiB default.
    est = (2 * block_b * H * jnp.dtype(x.dtype).itemsize
           + H * H * jnp.dtype(w1.dtype).itemsize
           + 2 * 8 * max(H, 128) * 4
           + 2 * 8 * max(block_b, 128) * 4
           + 4 * block_b * H * 4)
    vmem_limit = int(min(max(2 * est, 32 * 1024 * 1024), 64 * 1024 * 1024))

    out = pl.pallas_call(
        matching_head_kernel,
        out_shape=jax.ShapeDtypeStruct((1, padded_B), jnp.float32),
        grid_spec=pltpu.PrefetchScalarGridSpec(
            num_scalar_prefetch=0,
            grid=(num_blocks,),
            in_specs=[
                pl.BlockSpec((block_b, H), lambda i: (i, 0)),          # x tile
                pl.BlockSpec((H, H), lambda i: (0, 0),
                             pipeline_mode=pl.Buffered(1)),            # w1 (resident)
                pl.BlockSpec((1, H), lambda i: (0, 0),
                             pipeline_mode=pl.Buffered(1)),            # b1 (resident)
                pl.BlockSpec((1, H), lambda i: (0, 0),
                             pipeline_mode=pl.Buffered(1)),            # w2 row (resident)
                pl.BlockSpec(memory_space=pltpu.MemorySpace.SMEM),     # b2 scalar
            ],
            out_specs=pl.BlockSpec((1, block_b), lambda i: (0, i)),    # lane-dense
        ),
        compiler_params=pltpu.CompilerParams(
            dimension_semantics=("parallel",),
            vmem_limit_bytes=vmem_limit,
        ),
    )(x, w1, b1, w2_row, b2)

    return out[0, :B].reshape(B, 1).astype(orig_dtype)


def reference(x, w1, b1, w2, b2):
    pooled = jnp.tanh(x @ w1 + jnp.reshape(b1, (1, -1)))
    return pooled @ jnp.reshape(w2, (-1, 1)) + jnp.reshape(b2, (1, 1))


if __name__ == "__main__":
    key = jax.random.PRNGKey(0)
    keys = jax.random.split(key, 10)

    # --- Small shapes consistent with the module: batch=16, hidden=32 ---------
    B, H = 16, 32
    x = jax.random.normal(keys[0], (B, H), dtype=jnp.float32)
    w1 = jax.random.normal(keys[1], (H, H), dtype=jnp.float32) * (1.0 / jnp.sqrt(H))
    b1 = jax.random.normal(keys[2], (1, H), dtype=jnp.float32) * 0.01
    w2 = jax.random.normal(keys[3], (H, 1), dtype=jnp.float32) * (1.0 / jnp.sqrt(H))
    b2 = jax.random.normal(keys[4], (1, 1), dtype=jnp.float32) * 0.01

    out = jax.block_until_ready(matching_head(x, w1, b1, w2, b2))
    ref = reference(x, w1, b1, w2, b2)
    assert out.shape == (B, 1)
    assert jnp.allclose(out, ref, atol=1e-5, rtol=1e-5)

    # --- Multi-block + padded-tail path (batch not a multiple of the tile) ----
    B2, H2 = 272, 128
    x2 = jax.random.normal(keys[5], (B2, H2), dtype=jnp.float32)
    w12 = jax.random.normal(keys[6], (H2, H2), dtype=jnp.float32) * (1.0 / jnp.sqrt(H2))
    b12 = jax.random.normal(keys[7], (1, H2), dtype=jnp.float32) * 0.01
    w22 = jax.random.normal(keys[8], (H2, 1), dtype=jnp.float32) * (1.0 / jnp.sqrt(H2))
    b22 = jax.random.normal(keys[9], (1, 1), dtype=jnp.float32) * 0.01

    out2 = jax.block_until_ready(matching_head(x2, w12, b12, w22, b22))
    ref2 = reference(x2, w12, b12, w22, b22)
    assert out2.shape == (B2, 1)
    assert jnp.allclose(out2, ref2, atol=1e-4, rtol=1e-4)

    print("KERNEL_OK")
</pallas_src>

<mosaic_0001>
module attributes {stable_mosaic.version = 11 : i64} {
  func.func @matching_head_kernel(%arg0: i32, %arg1: memref<16x32xf32, #tpu.memory_space<vmem>>, %arg2: memref<32x32xf32, #tpu.memory_space<vmem>>, %arg3: memref<1x32xf32, #tpu.memory_space<vmem>>, %arg4: memref<1x32xf32, #tpu.memory_space<vmem>>, %arg5: memref<1x1xf32, #tpu.memory_space<smem>>, %arg6: memref<1x16xf32, #tpu.memory_space<vmem>>) attributes {dimension_semantics = [#tpu.dimension_semantics<parallel>], iteration_bounds = array<i64: 1>, scalar_prefetch = 0 : i64, scratch_operands = 0 : i64, tpu.core_type = #tpu.core_type<tc>, window_params = [{transform_indices = @transform_0, window_bounds = array<i64: 16, 32>}, {pipeline_mode = #tpu.pipeline_mode<synchronous>, transform_indices = @transform_1, window_bounds = array<i64: 32, 32>}, {pipeline_mode = #tpu.pipeline_mode<synchronous>, transform_indices = @transform_2, window_bounds = array<i64: 1, 32>}, {pipeline_mode = #tpu.pipeline_mode<synchronous>, transform_indices = @transform_3, window_bounds = array<i64: 1, 32>}, {transform_indices = @transform_4, window_bounds = array<i64: 1, 1>}, {transform_indices = @transform_5, window_bounds = array<i64: 1, 16>}]} {
    %c0 = arith.constant 0 : index
    %c0_0 = arith.constant 0 : index
    %0 = vector.load %arg1[%c0, %c0_0] : memref<16x32xf32, #tpu.memory_space<vmem>>, vector<16x32xf32>
    %c0_1 = arith.constant 0 : index
    %c0_2 = arith.constant 0 : index
    %1 = vector.load %arg2[%c0_1, %c0_2] : memref<32x32xf32, #tpu.memory_space<vmem>>, vector<32x32xf32>
    %cst = arith.constant dense<0.000000e+00> : vector<16x32xf32>
    %2 = tpu.matmul %0, %1, %cst {dimension_numbers = #tpu.dot_dimension_numbers<[1], [0], [0], [1], [0, 0, 1, 1], [], []>} : vector<16x32xf32>, vector<32x32xf32>, vector<16x32xf32> -> vector<16x32xf32>
    %c0_3 = arith.constant 0 : index
    %c0_4 = arith.constant 0 : index
    %3 = vector.load %arg3[%c0_3, %c0_4] : memref<1x32xf32, #tpu.memory_space<vmem>>, vector<1x32xf32>
    %4 = vector.broadcast %3 : vector<1x32xf32> to vector<16x32xf32>
    %5 = arith.addf %2, %4 : vector<16x32xf32>
    %6 = math.tanh %5 : vector<16x32xf32>
    %c0_5 = arith.constant 0 : index
    %c0_6 = arith.constant 0 : index
    %7 = vector.load %arg4[%c0_5, %c0_6] : memref<1x32xf32, #tpu.memory_space<vmem>>, vector<1x32xf32>
    %8 = vector.broadcast %7 : vector<1x32xf32> to vector<16x32xf32>
    %9 = arith.mulf %6, %8 : vector<16x32xf32>
    %cst_7 = arith.constant dense<0.000000e+00> : vector<16xf32>
    %10 = vector.multi_reduction <add>, %9, %cst_7 [1] : vector<16x32xf32> to vector<16xf32>
    %c0_8 = arith.constant 0 : index
    %c0_9 = arith.constant 0 : index
    %11 = memref.load %arg5[%c0_8, %c0_9] : memref<1x1xf32, #tpu.memory_space<smem>>
    %12 = vector.broadcast %11 : f32 to vector<16xf32>
    %13 = arith.addf %10, %12 : vector<16xf32>
    %14 = vector.shape_cast %13 : vector<16xf32> to vector<1x16xf32>
    %c0_10 = arith.constant 0 : index
    %c0_11 = arith.constant 0 : index
    %15 = vector.load %arg6[%c0_10, %c0_11] : memref<1x16xf32, #tpu.memory_space<vmem>>, vector<1x16xf32>
    tpu.vector_store %arg6[%c0_10, %c0_11], %14 {strides = array<i32>} : memref<1x16xf32, #tpu.memory_space<vmem>>, vector<1x16xf32>,
    return
  }
  func.func @transform_0(%arg0: i32) -> (i32, i32) {
    %c0_i32 = arith.constant 0 : i32
    %c0_i32_0 = arith.constant 0 : i32
    return %arg0, %c0_i32 : i32, i32
  }
  func.func @transform_1(%arg0: i32) -> (i32, i32) {
    %c0_i32 = arith.constant 0 : i32
    %c0_i32_0 = arith.constant 0 : i32
    %c0_i32_1 = arith.constant 0 : i32
    return %c0_i32, %c0_i32_0 : i32, i32
  }
  func.func @transform_2(%arg0: i32) -> (i32, i32) {
    %c0_i32 = arith.constant 0 : i32
    %c0_i32_0 = arith.constant 0 : i32
    %c0_i32_1 = arith.constant 0 : i32
    return %c0_i32, %c0_i32_0 : i32, i32
  }
  func.func @transform_3(%arg0: i32) -> (i32, i32) {
    %c0_i32 = arith.constant 0 : i32
    %c0_i32_0 = arith.constant 0 : i32
    %c0_i32_1 = arith.constant 0 : i32
    return %c0_i32, %c0_i32_0 : i32, i32
  }
  func.func @transform_4(%arg0: i32) -> (i32, i32) {
    %c0_i32 = arith.constant 0 : i32
    %c0_i32_0 = arith.constant 0 : i32
    %c0_i32_1 = arith.constant 0 : i32
    return %c0_i32, %c0_i32_0 : i32, i32
  }
  func.func @transform_5(%arg0: i32) -> (i32, i32) {
    %c0_i32 = arith.constant 0 : i32
    %c0_i32_0 = arith.constant 0 : i32
    return %c0_i32, %arg0 : i32, i32
  }
}

</mosaic_0001>

<bundles_post_ra>
// kernel: matching_head.1
= control target key start
LH: loop header
LB: loop body
LE: loop exit
PB: predicated region body
PF: predicated region fallthrough
CT: control target
= control target key end

     0   :  { %11 = vsyncpa [#allocation4], 0  ;;  %s394_s0 = inlined_call_operand.hbm [shape: f32[16,32], index: 0, kind: input, shape index: {}]   ;;  %s395_s1 = inlined_call_operand.hbm [shape: f32[32,32], index: 1, kind: input, shape index: {}]   ;;  %s396_s2 = inlined_call_operand.vmem [shape: f32[1,32], index: 2, kind: input, shape index: {}]   ;;  %s397_s3 = inlined_call_operand.vmem [shape: f32[1,32], index: 3, kind: input, shape index: {}]   ;;  %s398_s4 = inlined_call_operand.<no memory space> [shape: f32[1,1], index: 4, kind: input, shape index: {}]   ;;  %s399_s5 = inlined_call_operand.hbm [shape: f32[1,16], index: 5, kind: output, shape index: {}]  }
   0x1   :  { %12 = vsyncpa [#allocation7], 0 }
   0x2   :  { %13 = vsyncpa [#allocation5], 0  ;;  %s310_s18 = smov [#allocation3]   ;;  %s238_s22 = scalar_lea.hbm %s394_s0, 256 }
   0x3   :  { %s19_s19 = sshll.u32 %s310_s18, 4  ;;  %p239_p0 = scmp.ne.s32.totalorder %s394_s0, %s238_s22  ;;  %s20_s19 = int_to_ptr.vmem [resolvable:$true] %s19_s19 }
   0x4   :  { %p242_p1 = scmp.lt.u32.totalorder %s238_s22, %s394_s0 }
   0x6   :  { %p244_p2 = pnand %p242_p1, %p239_p0 }
   0x8   :  { %247 = shalt.err (!%p244_p2)
}
   0x9   :  { %s248_s27 = scalar_lea.vmem %s20_s19, 256  ;;  %p253_p4 = scmp.lt.s32.totalorder %s20_s19, %s20_s19 }
   0xa   :  { %p249_p3 = scmp.ne.s32.totalorder %s20_s19, %s248_s27  ;;  %p254_p5 = scmp.lt.s32.totalorder %s248_s27, %s248_s27 }
   0xc   :  { %p255_p6 = por %p254_p5, %p253_p4 }
   0xe   :  { %p256_p7 = pnand %p255_p6, %p249_p3 }
  0x10   :  { %259 = shalt.err (!%p256_p7)
}
  0x11   :  { %s311_s28 = smov 128   ;;  %s312_s29 = smov 8  }
  0x12   :  { %25 = dma.hbm_to_vmem [thread:$0]  %s394_s0, 256, %s20_s19, [#allocation4], %s311_s28, %s311_s28, %s312_s29  }
  0x13   :  { %s313_s7 = smov [#allocation6]   ;;  %s260_s11 = scalar_lea.hbm %s395_s1, 512 }
  0x14   :  { %s31_s8 = sshll.u32 %s313_s7, 4  ;;  %p261_p8 = scmp.ne.s32.totalorder %s395_s1, %s260_s11  ;;  %s32_s8 = int_to_ptr.vmem [resolvable:$true] %s31_s8 }
  0x15   :  { %p264_p9 = scmp.lt.u32.totalorder %s260_s11, %s395_s1 }
  0x17   :  { %p266_p10 = pnand %p264_p9, %p261_p8 }
  0x19   :  { %269 = shalt.err (!%p266_p10)
}
  0x1a   :  { %s270_s16 = scalar_lea.vmem %s32_s8, 512  ;;  %p275_p12 = scmp.lt.s32.totalorder %s32_s8, %s32_s8 }
  0x1b   :  { %p271_p11 = scmp.ne.s32.totalorder %s32_s8, %s270_s16  ;;  %p276_p13 = scmp.lt.s32.totalorder %s270_s16, %s270_s16 }
  0x1d   :  { %p277_p0 = por %p276_p13, %p275_p12 }
  0x1f   :  { %p278_p1 = pnand %p277_p0, %p271_p11 }
  0x21   :  { %281 = shalt.err (!%p278_p1)
}
  0x22   :  { %37 = dma.hbm_to_vmem [thread:$0]  %s395_s1, 512, %s32_s8, [#allocation7], %s311_s28, %s311_s28, %s312_s29  }
  0x23   :  { %304 = dma.done.wait [#allocation4], 256  }
  0x24   :  { %305 = vsyncadd [#allocation4], 4294967040 }
  0x25   :  { %306 = dma.done.wait [#allocation7], 512  }
  0x26   :  { %307 = vsyncadd [#allocation7], 4294966784  ;;  %vm63_vm0 = vcmask 261120   ;;  %v52_v0 = vld [vmem:[#allocation6] sm:$0xff]  ;;  %v53_v1 = vld [vmem:[#allocation6 + $0x8] sm:$0xff]  ;;  %v168_v20 = vlaneseq  ;;  %v163_v24 = vstv %s398_s4  ;;  %vm179_vm1 = vcmask 130112  }
  0x27   :  { %v54_v2 = vld [vmem:[#allocation6 + $0x10] sm:$0xff]  ;;  %v221_v3 = vpack.c.bf16 %v53_v1, %v52_v0  ;;  %v55_v4 = vld [vmem:[#allocation6 + $0x18] sm:$0xff]  ;;  %vm182_vm2 = vcmask 122880  }
  0x28   :  { %v50_v5 = vld [vmem:[#allocation3] sm:$0xff]  ;;  %v225_v6 = vpack.c.bf16 %v55_v4, %v54_v2  ;;  %v51_v7 = vld [vmem:[#allocation3 + $0x8] sm:$0xff]  ;;  %v169_v21 = vand.u32 127, %v168_v20  ;;  %v171_v22 = vshrl.u32 %v168_v20, 7 }
  0x29   :  { %218 = vmatprep.mubr.msk.f32.mxu0 %vm63_vm0, %v50_v5  ;;  %222 = vmatprep.subr.bf16.mxu0 %v221_v3  ;;  %v200_v8 = vld [vmem:[%s396_s2] ss:$0 sm:$0xff] }
  0x2a   :  { %224 = vmatpush3.bf16.msra.mxu0 %v221_v3  ;;  %v203_v13 = vld [vmem:[%s397_s3] ss:$0 sm:$0xff]  ;;  %v174_v23 = vadd.s32 4294967288, %v169_v21  ;;  %v172_v26 = vsub.s32 %v169_v21, %v171_v22  ;;  %s314_s3 = smov [#allocation8]  }
  0x2b   :  { %226 = vmatprep.subr.bf16.mxu0 %v225_v6  ;;  %s190_s22 = sshll.u32 %s314_s3, 4  ;;  %s191_s22 = int_to_ptr.vmem [resolvable:$true] %s190_s22 }
  0x2c   :  { %v177_v28 = vsub.s32 %v174_v23, %v171_v22  ;;  %s282_s23 = scalar_lea.vmem %s191_s22, 16  ;;  %s286_s24 = scalar_lea.vmem %s191_s22, 32 }
  0x2d   :  { %p283_p2 = scmp.ne.s32.totalorder %s191_s22, %s282_s23  ;;  %p287_p3 = scmp.lt.s32.totalorder %s191_s22, %s191_s22 }
  0x2e   :  { %228 = vmatpush3.bf16.msra.mxu0 %v225_v6  ;;  %p288_p4 = scmp.lt.s32.totalorder %s286_s24, %s282_s23 }
  0x30   :  { %p289_p5 = por %p288_p4, %p287_p3 }
  0x31   :  { %219 = vmatmul.mubr.msk.f32.vlgmr.msra.gmra.mrb[0].mxu0 %vm63_vm0, %v51_v7 }
  0x32   :  { %p290_p6 = pnand %p289_p5, %p283_p2 }
 0x104   :  { %v220_v9 = vpop.f32.mrb[0].mxu0 }
 0x105   :  { %v142_v10 = vadd.f32 %v220_v9, %v200_v8  ;;  %v136_v11 = vpop.f32.mrb[1].mxu0 }
 0x106   :  { %v137_v12 = vadd.f32 %v200_v8, %v136_v11 }
 0x107   :  { %234 = vtanh.f32 %v142_v10 }
 0x108   :  { %236 = vtanh.f32 %v137_v12 }
 0x111   :  { %v235_v14 = vpop.eup %234 }
 0x112   :  { %v237_v15 = vpop.eup %236  ;;  %v155_v18 = vmul.f32 %v235_v14, %v203_v13 }
 0x113   :  { %v154_v16 = vmul.f32 %v237_v15, %v203_v13 }
 0x114   :  { %v159_v19 = vsel %vm63_vm0, %v155_v18, 0.0 }
 0x115   :  { %v156_v17 = vsel %vm63_vm0, %v154_v16, 0.0 }
 0x116   :  { %157 = vadd.xlane.f32.xlu0 %v156_v17 }
 0x11a   :  { %160 = vadd.xlane.f32.xlu0 %v159_v19 }
 0x1a3   :  { %v158_v25 = vpop.xlane.xlu0 %157 }
 0x1a4   :  { %v164_v27 = vadd.f32 %v163_v24, %v158_v25 }
 0x1a6   :  { %v173_v31 = vrot.slane %v164_v27, %v172_v26 }
 0x1a7   :  { %v161_v29 = vpop.xlane.xlu0 %160 }
 0x1a8   :  { %v165_v30 = vadd.f32 %v163_v24, %v161_v29 }
 0x1aa   :  { %v178_v32 = vrot.slane %v165_v30, %v177_v28 }
 0x1ac   :  { %v180_v33 = vsel %vm179_vm1, %v178_v32, %v173_v31 }
 0x1ad   :  { %183 = vst.msk [vmem:[#allocation8] sm:$0x1] %vm182_vm2, %v180_v33 }
 0x1ae   :  { %293 = shalt.err (!%p290_p6)
}
 0x1af   :  { %s294_s26 = scalar_lea.hbm %s399_s5, 16 }
 0x1b0   :  { %p295_p7 = scmp.ne.s32.totalorder %s399_s5, %s294_s26  ;;  %p298_p8 = scmp.lt.u32.totalorder %s294_s26, %s399_s5 }
 0x1b2   :  { %p300_p9 = pnand %p298_p8, %p295_p7 }
 0x1b4   :  { %303 = shalt.err (!%p300_p9)
}
 0x1b5   :  { %193 = dma.vmem_to_hbm [thread:$0]  %s191_s22, 16, %s399_s5, [#allocation5]  }
 0x1b6   :  { %308 = dma.done.wait [#allocation5], 16  }
 0x1b7   :  { %309 = vsyncadd [#allocation5], 4294967280 }
 0x1b8   :  { %197 = vsyncpa [#allocation4], 1 }
 0x1b9   :  { %198 = vsyncpa [#allocation7], 1 }
 0x1ba   :  { %199 = vsyncpa [#allocation5], 1 }

</bundles_post_ra>
